<compile_context>
chip_gen: v6e
topology: v6e:2x2x1
jax: 0.10.0
libtpu: 0.0.40
codegen_flags: <defaults>
</compile_context>

<pallas_src>
import jax
import jax.numpy as jnp
from jax.experimental import pallas as pl
from jax.experimental.pallas import tpu as pltpu


# Conservative double-buffered VMEM footprint budget (bytes); safe on v5e/v6e/v7x.
_VMEM_BUDGET = 24 << 20


def _kernel(x_ref, w_ref, b_ref, o_ref):
    # x_ref: (tb, gb*ipg)            activation tile
    # w_ref: (1, gb*ipg, gb*opg)     block-diagonal weight chunk (pre-packed)
    # b_ref: (1, gb*opg)             f32 bias slice
    # o_ref: (tb, gb*opg)            output slab (single lane-dense store)
    acc = jnp.dot(x_ref[...], w_ref[0], preferred_element_type=jnp.float32)
    acc = acc + b_ref[...]
    o_ref[...] = acc.astype(o_ref.dtype)


def _footprint_bytes(tb, gb, ipg, opg, dtype_bytes=4):
    """Approx double-buffered VMEM footprint of one pipeline step."""
    per_step = tb * gb * ipg + gb * ipg * gb * opg + gb * opg + tb * gb * opg
    return 2 * per_step * dtype_bytes


def _choose_group_block(G, ipg, opg):
    """Pick how many whole groups to pack per chunk (gb)."""
    divisors = [d for d in range(1, G + 1) if G % d == 0]

    def in_ok(gb):
        return (gb * ipg) % 128 == 0 or gb == G      # block == full Cin also legal

    def out_ok(gb):
        return (gb * opg) % 128 == 0 or gb == G      # block == full Cout also legal

    def lane_dense(gb):
        return in_ok(gb) and out_ok(gb)

    def mxu_wide(gb):                                 # v6e/v7x: 256x256 MXU tiles
        return (((gb * ipg) % 256 == 0 or gb == G)
                and ((gb * opg) % 256 == 0 or gb == G))

    # Tiered preference; within a tier take the SMALLEST gb (minimizes the zero
    # padding inside the block-diagonal chunk, i.e. wasted weight HBM bytes).
    tiers = (
        lambda gb: lane_dense(gb) and mxu_wide(gb) and gb * opg >= 1024,
        lambda gb: lane_dense(gb) and gb * opg >= 512,
        lane_dense,
    )
    for pred in tiers:
        cands = [gb for gb in divisors if pred(gb)]
        if cands:
            return min(cands)
    return G


def _choose_batch_block(B, gb, ipg, opg):
    """Target 512-row tiles; shrink (multiple of 8) only if the VMEM budget demands."""
    tb = 512
    if B < tb:
        tb = max(8, ((B + 7) // 8) * 8)
    while tb > 8 and _footprint_bytes(tb, gb, ipg, opg) > _VMEM_BUDGET:
        tb = max(8, ((tb // 2 + 7) // 8) * 8)
    return tb


def grouped_linear_prepack(weight, bias, groups, weight_dtype=None):
    """One-time weight/bias repack (hoist out of the per-call path for inference).

    weight: Conv1d layout (Cout, Cin//G, 1) or (Cout, Cin//G); bias: (Cout,) or None.
    weight_dtype: optionally cast packed weights (e.g. jnp.bfloat16); f32 accumulation
                  is preserved inside the kernel via preferred_element_type.
    Returns (w_bd, b2, meta) for grouped_linear_prepacked.
    """
    if weight.ndim == 3:                      # Conv1d kernel: (Cout, ipg, 1)
        weight = weight[..., 0]
    Cout, ipg = weight.shape
    G = groups
    assert Cout % G == 0, "out_features must be divisible by groups"
    opg = Cout // G
    Cin = G * ipg

    # Group-major (G, ipg, opg): y_g = x_g @ w_g[g] + b_g
    w_g = weight.reshape(G, opg, ipg).transpose(0, 2, 1)

    gb = _choose_group_block(G, ipg, opg)
    n_chunks = G // gb

    # Pack each chunk of gb groups into a block-diagonal (gb*ipg, gb*opg) matrix so the
    # kernel runs ONE matmul per step (zeros packed once, here).
    wc = w_g.reshape(n_chunks, gb, ipg, opg)
    eye = jnp.eye(gb, dtype=w_g.dtype)
    w_bd = jnp.einsum("jk,cjio->cjiko", eye, wc).reshape(n_chunks, gb * ipg, gb * opg)
    if weight_dtype is not None:
        w_bd = w_bd.astype(weight_dtype)

    if bias is None:
        bias = jnp.zeros((Cout,), dtype=jnp.float32)
    b2 = bias.reshape(1, Cout).astype(jnp.float32)    # f32 bias add (matches PyTorch)

    meta = dict(G=G, gb=gb, ipg=ipg, opg=opg, Cin=Cin, Cout=Cout)
    return w_bd, b2, meta


def grouped_linear_prepacked(x, w_bd, b2, meta):
    """x: (B, Cin); w_bd/b2/meta from grouped_linear_prepack. Returns (B, Cout)."""
    B, Cin = x.shape
    gb, ipg, opg = meta["gb"], meta["ipg"], meta["opg"]
    G, Cout = meta["G"], meta["Cout"]
    assert Cin == meta["Cin"], "in_features mismatch"
    n_chunks = G // gb

    tb = _choose_batch_block(B, gb, ipg, opg)
    n_btiles = pl.cdiv(B, tb)
    B_pad = n_btiles * tb
    if B_pad != B:
        x = jnp.pad(x, ((0, B_pad - B), (0, 0)))      # pad rows are sliced off below

    fp = _footprint_bytes(tb, gb, ipg, opg)
    vmem_limit = min(max(fp + (8 << 20), 32 << 20), 112 << 20)

    y = pl.pallas_call(
        _kernel,
        out_shape=jax.ShapeDtypeStruct((B_pad, Cout), x.dtype),
        grid_spec=pltpu.PrefetchScalarGridSpec(
            num_scalar_prefetch=0,
            # Group chunks OUTERMOST, batch tiles innermost: the weight block index
            # is constant across consecutive steps, so each weight chunk is DMA'd
            # from HBM exactly once (not once per batch tile).
            grid=(n_chunks, n_btiles),
            in_specs=[
                # x: batch tile i, contiguous input-column slice for group chunk g.
                pl.BlockSpec((tb, gb * ipg), lambda g, i: (i, g)),
                # block-diagonal weight chunk g (constant over the inner batch axis).
                pl.BlockSpec((1, gb * ipg, gb * opg), lambda g, i: (g, 0, 0)),
                # f32 bias slice for chunk g.
                pl.BlockSpec((1, gb * opg), lambda g, i: (0, g)),
            ],
            out_specs=pl.BlockSpec((tb, gb * opg), lambda g, i: (i, g)),
        ),
        compiler_params=pltpu.CompilerParams(
            # No reduction axis: both grid axes independent -> megacore / v7x dual-TC
            # can shard over batch tiles as well as group chunks.
            dimension_semantics=("parallel", "parallel"),
            vmem_limit_bytes=vmem_limit,
        ),
    )(x, w_bd, b2)

    return y[:B] if B_pad != B else y


def grouped_linear(x, weight, bias, groups):
    """Convenience entry (PyTorch layout). For inference, call grouped_linear_prepack
    once (static weights) and grouped_linear_prepacked per step."""
    w_bd, b2, meta = grouped_linear_prepack(weight, bias, groups)
    return grouped_linear_prepacked(x, w_bd, b2, meta)


def grouped_linear_ref(x, weight, bias, groups):
    B, Cin = x.shape
    Cout = weight.shape[0]
    ipg = Cin // groups
    opg = Cout // groups
    x_g = x.reshape(B, groups, ipg)
    w_g = weight[..., 0].reshape(groups, opg, ipg)
    y = jnp.einsum("bgi,goi->bgo", x_g, w_g) + bias.reshape(groups, opg)
    return y.reshape(B, Cout)


if __name__ == "__main__":
    # Small shapes consistent with the module: in_features=32, out_features=64, groups=4.
    B, Cin, Cout, G = 8, 32, 64, 4

    key = jax.random.PRNGKey(0)
    kx, kw, kb, kx2 = jax.random.split(key, 4)
    x = jax.random.normal(kx, (B, Cin), dtype=jnp.float32)
    # Conv1d(in, out, kernel_size=1, groups=G) weight shape: (out, in//G, 1)
    weight = jax.random.normal(kw, (Cout, Cin // G, 1), dtype=jnp.float32) * 0.1
    bias = jax.random.normal(kb, (Cout,), dtype=jnp.float32) * 0.1

    # Prepack once (the per-call path touches only the kernel).
    w_bd, b2, meta = grouped_linear_prepack(weight, bias, G)

    y = jax.block_until_ready(grouped_linear_prepacked(x, w_bd, b2, meta))
    y_ref = grouped_linear_ref(x, weight, bias, G)
    assert y.shape == (B, Cout)
    assert jnp.allclose(y, y_ref, atol=1e-5, rtol=1e-5), "mismatch vs reference (B=8)"

    # Non-divisible batch exercises the cdiv + pad path.
    B2 = 10
    x2 = jax.random.normal(kx2, (B2, Cin), dtype=jnp.float32)
    y2 = jax.block_until_ready(grouped_linear_prepacked(x2, w_bd, b2, meta))
    y2_ref = grouped_linear_ref(x2, weight, bias, G)
    assert y2.shape == (B2, Cout)
    assert jnp.allclose(y2, y2_ref, atol=1e-5, rtol=1e-5), "mismatch vs reference (B=10)"

    print("KERNEL_OK")
</pallas_src>

<mosaic_0001>
module attributes {stable_mosaic.version = 11 : i64} {
  func.func @_kernel(%arg0: i32, %arg1: i32, %arg2: memref<8x32xf32, #tpu.memory_space<vmem>>, %arg3: memref<1x32x64xf32, #tpu.memory_space<vmem>>, %arg4: memref<1x64xf32, #tpu.memory_space<vmem>>, %arg5: memref<8x64xf32, #tpu.memory_space<vmem>>) attributes {dimension_semantics = [#tpu.dimension_semantics<parallel>, #tpu.dimension_semantics<parallel>], iteration_bounds = array<i64: 1, 1>, scalar_prefetch = 0 : i64, scratch_operands = 0 : i64, tpu.core_type = #tpu.core_type<tc>, window_params = [{transform_indices = @transform_0, window_bounds = array<i64: 8, 32>}, {transform_indices = @transform_1, window_bounds = array<i64: 1, 32, 64>}, {transform_indices = @transform_2, window_bounds = array<i64: 1, 64>}, {transform_indices = @transform_3, window_bounds = array<i64: 8, 64>}]} {
    %c0 = arith.constant 0 : index
    %c0_0 = arith.constant 0 : index
    %0 = vector.load %arg2[%c0, %c0_0] : memref<8x32xf32, #tpu.memory_space<vmem>>, vector<8x32xf32>
    %c0_1 = arith.constant 0 : index
    %c0_2 = arith.constant 0 : index
    %c0_3 = arith.constant 0 : index
    %1 = vector.load %arg3[%c0_1, %c0_2, %c0_3] : memref<1x32x64xf32, #tpu.memory_space<vmem>>, vector<1x32x64xf32>
    %2 = vector.shape_cast %1 : vector<1x32x64xf32> to vector<32x64xf32>
    %cst = arith.constant dense<0.000000e+00> : vector<8x64xf32>
    %3 = tpu.matmul %0, %2, %cst {dimension_numbers = #tpu.dot_dimension_numbers<[1], [0], [0], [1], [0, 0, 1, 1], [], []>} : vector<8x32xf32>, vector<32x64xf32>, vector<8x64xf32> -> vector<8x64xf32>
    %c0_4 = arith.constant 0 : index
    %c0_5 = arith.constant 0 : index
    %4 = vector.load %arg4[%c0_4, %c0_5] : memref<1x64xf32, #tpu.memory_space<vmem>>, vector<1x64xf32>
    %5 = vector.broadcast %4 : vector<1x64xf32> to vector<8x64xf32>
    %6 = arith.addf %3, %5 : vector<8x64xf32>
    %c0_6 = arith.constant 0 : index
    %c0_7 = arith.constant 0 : index
    %7 = vector.load %arg5[%c0_6, %c0_7] : memref<8x64xf32, #tpu.memory_space<vmem>>, vector<8x64xf32>
    tpu.vector_store %arg5[%c0_6, %c0_7], %6 {strides = array<i32>} : memref<8x64xf32, #tpu.memory_space<vmem>>, vector<8x64xf32>,
    return
  }
  func.func @transform_0(%arg0: i32, %arg1: i32) -> (i32, i32) {
    %c0_i32 = arith.constant 0 : i32
    return %arg1, %arg0 : i32, i32
  }
  func.func @transform_1(%arg0: i32, %arg1: i32) -> (i32, i32, i32) {
    %c0_i32 = arith.constant 0 : i32
    %c0_i32_0 = arith.constant 0 : i32
    %c0_i32_1 = arith.constant 0 : i32
    return %arg0, %c0_i32, %c0_i32_0 : i32, i32, i32
  }
  func.func @transform_2(%arg0: i32, %arg1: i32) -> (i32, i32) {
    %c0_i32 = arith.constant 0 : i32
    %c0_i32_0 = arith.constant 0 : i32
    return %c0_i32, %arg0 : i32, i32
  }
  func.func @transform_3(%arg0: i32, %arg1: i32) -> (i32, i32) {
    %c0_i32 = arith.constant 0 : i32
    return %arg1, %arg0 : i32, i32
  }
}

</mosaic_0001>

<bundles_post_ra>
// kernel: tpu_custom_call.1
= control target key start
LH: loop header
LB: loop body
LE: loop exit
PB: predicated region body
PF: predicated region fallthrough
CT: control target
= control target key end

     0   :  { %8 = vsyncpa [#allocation3], 0  ;;  %s275_s0 = inlined_call_operand.hbm [shape: f32[8,32], index: 0, kind: input, shape index: {}]   ;;  %s276_s1 = inlined_call_operand.hbm [shape: f32[1,32,64], index: 1, kind: input, shape index: {}]   ;;  %s277_s2 = inlined_call_operand.vmem [shape: f32[1,64], index: 2, kind: input, shape index: {}]   ;;  %s278_s3 = inlined_call_operand.hbm [shape: f32[8,64], index: 3, kind: output, shape index: {}]  }
   0x1   :  { %9 = vsyncpa [#allocation6], 0 }
   0x2   :  { %10 = vsyncpa [#allocation4], 0  ;;  %s236_s12 = smov [#allocation2]   ;;  %s237_s14 = smov [#allocation5]  }
   0x3   :  { %s17_s13 = sshll.u32 %s236_s12, 4  ;;  %s26_s15 = sshll.u32 %s237_s14, 4  ;;  %s18_s13 = int_to_ptr.vmem [resolvable:$true] %s17_s13  ;;  %s27_s15 = int_to_ptr.vmem [resolvable:$true] %s26_s15 }
   0x4   :  { %s178_s16 = scalar_lea.vmem %s18_s13, 128  ;;  %p183_p1 = scmp.lt.s32.totalorder %s18_s13, %s18_s13 }
   0x5   :  { %p179_p0 = scmp.ne.s32.totalorder %s18_s13, %s178_s16  ;;  %p184_p2 = scmp.lt.s32.totalorder %s178_s16, %s178_s16 }
   0x7   :  { %p185_p3 = por %p184_p2, %p183_p1 }
   0x9   :  { %p186_p4 = pnand %p185_p3, %p179_p0 }
   0xb   :  { %189 = shalt.err (!%p186_p4)
}
   0xc   :  { %20 = dma.hbm_to_vmem [thread:$0]  %s275_s0, 128, %s18_s13, [#allocation3]  }
   0xd   :  { %s198_s19 = scalar_lea.vmem %s27_s15, 512  ;;  %p203_p6 = scmp.lt.s32.totalorder %s27_s15, %s27_s15 }
   0xe   :  { %p199_p5 = scmp.ne.s32.totalorder %s27_s15, %s198_s19  ;;  %p204_p7 = scmp.lt.s32.totalorder %s198_s19, %s198_s19 }
  0x10   :  { %p205_p8 = por %p204_p7, %p203_p6 }
  0x12   :  { %p206_p9 = pnand %p205_p8, %p199_p5 }
  0x14   :  { %209 = shalt.err (!%p206_p9)
}
  0x15   :  { %s238_s20 = smov 128   ;;  %s239_s21 = smov 8  }
  0x16   :  { %32 = dma.hbm_to_vmem [thread:$0]  %s276_s1, 512, %s27_s15, [#allocation6], %s238_s20, %s238_s20, %s239_s21  }
  0x17   :  { %230 = dma.done.wait [#allocation3], 128  }
  0x18   :  { %231 = vsyncadd [#allocation3], 4294967168 }
  0x19   :  { %232 = dma.done.wait [#allocation6], 512  }
  0x1a   :  { %233 = vsyncadd [#allocation6], 4294966784  ;;  %v240_v0 = vmov 0.0   ;;  %vm241_vm0 = vmmov 0   ;;  %v45_v1 = vld [vmem:[#allocation5 + $0x18] sm:$0xff]  ;;  %v44_v2 = vld [vmem:[#allocation5 + $0x10] sm:$0xff] }
  0x1b   :  { %152 = vmatprep.subr.mxu0 %v240_v0  ;;  %160 = vmatprep.mubr.msk.f32.mxu0 %vm241_vm0, %v240_v0  ;;  %v43_v3 = vld [vmem:[#allocation5 + $0x8] sm:$0xff]  ;;  %v42_v4 = vld [vmem:[#allocation5] sm:$0xff]  ;;  %v41_v5 = vld [vmem:[#allocation2] sm:$0xff]  ;;  %vm53_vm1 = vcmask 261120   ;;  %s242_s24 = smov [#allocation7]   ;;  %vm127_vm2 = vcmask 523264  }
  0x1c   :  { %153 = vmatpush3.msra.mxu0 %v45_v1  ;;  %v145_v6 = vld [vmem:[%s277_s2] ss:$0 sm:$0xff]  ;;  %s135_s25 = sshll.u32 %s242_s24, 4  ;;  %s136_s25 = int_to_ptr.vmem [resolvable:$true] %s135_s25 }
  0x1d   :  { %154 = vmatprep.subr.mxu0 %v240_v0  ;;  %s210_s26 = scalar_lea.vmem %s136_s25, 128  ;;  %p215_p11 = scmp.lt.s32.totalorder %s136_s25, %s136_s25 }
  0x1e   :  { %155 = vmatpush3.msra.mxu0 %v44_v2  ;;  %p211_p10 = scmp.ne.s32.totalorder %s136_s25, %s210_s26  ;;  %p216_p12 = scmp.lt.s32.totalorder %s210_s26, %s210_s26 }
  0x1f   :  { %156 = vmatprep.subr.mxu0 %v240_v0 }
  0x20   :  { %157 = vmatpush3.msra.mxu0 %v43_v3  ;;  %p217_p13 = por %p216_p12, %p215_p11 }
  0x21   :  { %158 = vmatprep.subr.mxu0 %v240_v0 }
  0x22   :  { %159 = vmatpush3.msra.mxu0 %v42_v4  ;;  %p218_p0 = pnand %p217_p13, %p211_p10 }
  0x23   :  { %161 = vmatmul.mubr.msk.f32.vlgmr.msra.gmra.mxu0 %vm53_vm1, %v41_v5 }
  0xe3   :  { %v123_v7 = vpop.f32.mrf.mxu0 }
  0xe4   :  { %v124_v8 = vadd.f32 %v145_v6, %v123_v7 }
  0xe5   :  { %v162_v9 = vpop.f32.mrf.mxu0 }
  0xe6   :  { %128 = vst.msk [vmem:[#allocation7] sm:$0xff] %vm127_vm2, %v124_v8 }
  0xe7   :  { %221 = shalt.err (!%p218_p0)
}
  0xe8   :  { %138 = dma.vmem_to_hbm [thread:$0]  %s136_s25, 128, %s278_s3, [#allocation4]  }
  0xe9   :  { %234 = dma.done.wait [#allocation4], 128  }
  0xea   :  { %235 = vsyncadd [#allocation4], 4294967168 }
  0xeb   :  { %142 = vsyncpa [#allocation3], 1 }
  0xec   :  { %143 = vsyncpa [#allocation6], 1 }
  0xed   :  { %144 = vsyncpa [#allocation4], 1 }

</bundles_post_ra>
